<compile_context>
chip_gen: v6e
topology: v6e:2x2x1
jax: 0.10.0
libtpu: 0.0.40
codegen_flags: <defaults>
</compile_context>

<pallas_src>
from functools import partial

import jax
import jax.numpy as jnp
from jax.experimental import pallas as pl
from jax.experimental.pallas import tpu as pltpu


# ----------------------------------------------------------------------------
# Pallas kernel: T fused steps of {embedding-row gather, relu, GRU, projection,
# log-softmax}.  One grid iteration == one decode step.
# ----------------------------------------------------------------------------
def decoder_steps_kernel(
    tokens_ref,   # SMEM (T,) int32    token ids (scalar-prefetched; used by index_map)
    h0_ref,       # VMEM (1, Hp) f32   initial hidden state (read at t == 0 only)
    emb_row_ref,  # VMEM (1, Hp) bf16  embedding row for this step's token
    wi_ref,       # VMEM (Hp, 3*Hp) bf16  packed [W_ir^T | W_iz^T | W_in^T]
    wh_ref,       # VMEM (Hp, 3*Hp) bf16  packed [W_hr^T | W_hz^T | W_hn^T]
    b_ref,        # VMEM (1, 4*Hp) f32    packed [b_ir+b_hr | b_iz+b_hz | b_in | b_hn]
    wout_ref,     # VMEM (Hp, Vp) bf16    output projection (transposed, padded)
    bout_ref,     # VMEM (1, Vp) f32      output bias; padded vocab lanes = -1e30
    logp_ref,     # out VMEM (1, Vp) f32  log-probabilities for this step
    hnew_ref,     # out VMEM (1, Hp) f32  hidden state (final value flushed once)
    h_scr,        # scratch VMEM (1, Hp) f32  hidden-state carry across steps
    *,
    hp,           # static: padded hidden size
    wdtype,       # static: weight dtype (bf16) used for the MXU operands
):
    t = pl.program_id(0)

    @pl.when(t == 0)
    def _load_initial_hidden():
        h_scr[...] = h0_ref[...]

    h = h_scr[...]                                        # (1, Hp) f32 carry
    # output = relu(embedding(input))  -- row already gathered by the BlockSpec DMA.
    x = jnp.maximum(emb_row_ref[...], 0.0)                # (1, Hp) bf16

    # Two packed MXU matmuls (bf16 x bf16 -> f32) instead of six.
    gi = jnp.dot(x, wi_ref[...], preferred_element_type=jnp.float32)           # (1, 3*Hp)
    gh = jnp.dot(h.astype(wdtype), wh_ref[...], preferred_element_type=jnp.float32)
    b = b_ref[...]                                        # (1, 4*Hp) f32

    # PyTorch GRU semantics (gate order r, z, n):
    #   r  = sigmoid(W_ir x + b_ir + W_hr h + b_hr)
    #   z  = sigmoid(W_iz x + b_iz + W_hz h + b_hz)
    #   n  = tanh   (W_in x + b_in + r * (W_hn h + b_hn))
    #   h' = (1 - z) * n + z * h
    r = jax.nn.sigmoid(gi[:, 0:hp] + gh[:, 0:hp] + b[:, 0:hp])
    z = jax.nn.sigmoid(gi[:, hp:2 * hp] + gh[:, hp:2 * hp] + b[:, hp:2 * hp])
    n = jnp.tanh(gi[:, 2 * hp:3 * hp] + b[:, 2 * hp:3 * hp]
                 + r * (gh[:, 2 * hp:3 * hp] + b[:, 3 * hp:4 * hp]))
    h_new = (1.0 - z) * n + z * h                          # f32 carry precision
    h_scr[...] = h_new
    hnew_ref[...] = h_new

    # output = log_softmax(out(h'), dim=1); padded vocab lanes carry -1e30 via b_out.
    logits = jnp.dot(h_new.astype(wdtype), wout_ref[...],
                     preferred_element_type=jnp.float32) + bout_ref[...]
    m = jnp.max(logits, axis=1, keepdims=True)
    shifted = logits - m
    lse = jnp.log(jnp.sum(jnp.exp(shifted), axis=1, keepdims=True))
    logp_ref[...] = shifted - lse


def _decode_steps_pallas(tokens, h_pad, packed):
    T = tokens.shape[0]
    Hp, Vp = packed["Hp"], packed["Vp"]
    wdtype = packed["w_i"].dtype
    kernel = partial(decoder_steps_kernel, hp=Hp, wdtype=wdtype)

    grid_spec = pltpu.PrefetchScalarGridSpec(
        num_scalar_prefetch=1,
        grid=(T,),
        in_specs=[
            pl.BlockSpec((1, Hp), lambda t, toks: (0, 0)),                  # h0 (resident)
            pl.BlockSpec((None, 1, Hp), lambda t, toks: (toks[t], 0, 0)),   # emb row gather
            pl.BlockSpec((Hp, 3 * Hp), lambda t, toks: (0, 0)),             # w_i (resident)
            pl.BlockSpec((Hp, 3 * Hp), lambda t, toks: (0, 0)),             # w_h (resident)
            pl.BlockSpec((1, 4 * Hp), lambda t, toks: (0, 0)),              # biases (resident)
            pl.BlockSpec((Hp, Vp), lambda t, toks: (0, 0)),                 # w_out (resident)
            pl.BlockSpec((1, Vp), lambda t, toks: (0, 0)),                  # b_out (resident)
        ],
        out_specs=(
            pl.BlockSpec((None, 1, Vp), lambda t, toks: (t, 0, 0)),         # per-step log-probs
            pl.BlockSpec((1, Hp), lambda t, toks: (0, 0)),                  # final hidden
        ),
        scratch_shapes=[pltpu.VMEM((1, Hp), jnp.float32)],                  # hidden carry
    )

    return pl.pallas_call(
        kernel,
        grid_spec=grid_spec,
        out_shape=(
            jax.ShapeDtypeStruct((T, 1, Vp), jnp.float32),   # log-probs per step (padded)
            jax.ShapeDtypeStruct((1, Hp), jnp.float32),      # final hidden (padded)
        ),
        compiler_params=pltpu.CompilerParams(
            dimension_semantics=("arbitrary",),              # sequential carry over T
            vmem_limit_bytes=packed["vmem_limit_bytes"],
        ),
    )(
        tokens, h_pad,
        packed["emb"], packed["w_i"], packed["w_h"], packed["b"],
        packed["w_out"], packed["b_out"],
    )


# ----------------------------------------------------------------------------
# Parameter construction / packing (PyTorch layouts -> packed, padded, bf16).
# ----------------------------------------------------------------------------
def make_params(key, hidden_size, output_size):
    """Deterministic synthetic parameters mirroring DecoderRNN.__init__ shapes."""
    ks = jax.random.split(key, 7)
    H, V = hidden_size, output_size
    bound = 1.0 / jnp.sqrt(jnp.float32(H))
    return {
        "embedding": jax.random.normal(ks[0], (V, H), jnp.float32),                 # nn.Embedding(V, H)
        "w_ih": jax.random.uniform(ks[1], (3 * H, H), jnp.float32, -bound, bound),  # GRU weight_ih_l0
        "w_hh": jax.random.uniform(ks[2], (3 * H, H), jnp.float32, -bound, bound),  # GRU weight_hh_l0
        "b_ih": jax.random.uniform(ks[3], (3 * H,), jnp.float32, -bound, bound),
        "b_hh": jax.random.uniform(ks[4], (3 * H,), jnp.float32, -bound, bound),
        "w_out": jax.random.uniform(ks[5], (V, H), jnp.float32, -bound, bound),     # nn.Linear(H, V)
        "b_out": jax.random.uniform(ks[6], (V,), jnp.float32, -bound, bound),
    }


def _round_up(x, m):
    return ((x + m - 1) // m) * m


def _pad2(a, rows, cols):
    return jnp.pad(a, ((0, rows - a.shape[0]), (0, cols - a.shape[1])))


def _nbytes(a):
    return int(a.size) * a.dtype.itemsize


def pack_params(raw, hidden_size, output_size, weight_dtype=jnp.bfloat16):
    """Pad to 128-lane multiples, transpose for x @ W, pack gates/biases, cast bf16."""
    H, V = hidden_size, output_size
    Hp, Vp = _round_up(H, 128), _round_up(V, 128)

    def split3(w):
        return w[0:H], w[H:2 * H], w[2 * H:3 * H]

    w_ir, w_iz, w_in = split3(raw["w_ih"])
    w_hr, w_hz, w_hn = split3(raw["w_hh"])
    b_ir, b_iz, b_in = split3(raw["b_ih"])
    b_hr, b_hz, b_hn = split3(raw["b_hh"])

    def padT(w):  # (H, H) torch layout -> (Hp, Hp), oriented for x @ W
        return _pad2(w.T, Hp, Hp)

    w_i = jnp.concatenate([padT(w_ir), padT(w_iz), padT(w_in)], axis=1).astype(weight_dtype)
    w_h = jnp.concatenate([padT(w_hr), padT(w_hz), padT(w_hn)], axis=1).astype(weight_dtype)

    def pad1(b):
        return jnp.pad(b, (0, Hp - b.shape[0]))

    biases = jnp.concatenate(
        [pad1(b_ir + b_hr), pad1(b_iz + b_hz), pad1(b_in), pad1(b_hn)]
    ).reshape(1, 4 * Hp).astype(jnp.float32)

    # Embedding stays in HBM; laid out (Vp, 1, Hp) so a single (1, Hp) row block
    # can be gathered per step via a token-keyed index_map.
    emb = _pad2(raw["embedding"], Vp, Hp).astype(weight_dtype).reshape(Vp, 1, Hp)

    w_out = _pad2(raw["w_out"].T, Hp, Vp).astype(weight_dtype)     # (Hp, Vp)
    # Bake the padded-vocab mask into the bias (finite, no -inf/NaN propagation).
    b_out = jnp.concatenate(
        [raw["b_out"].astype(jnp.float32), jnp.full((Vp - V,), -1e30, jnp.float32)]
    ).reshape(1, Vp)

    # VMEM budget: resident weights/biases + small per-step blocks, x2 for
    # double buffering, plus slack.  Clamped to stay safe on v7x (64 MiB phys).
    resident = (_nbytes(w_i) + _nbytes(w_h) + _nbytes(w_out) + _nbytes(biases)
                + _nbytes(b_out) + 4 * Hp * 4 + 2 * Vp * 4
                + 2 * Hp * jnp.dtype(weight_dtype).itemsize)
    vmem_limit_bytes = int(max(16 << 20, min(48 << 20, 2 * resident + (2 << 20))))

    return {
        "emb": emb, "w_i": w_i, "w_h": w_h, "b": biases,
        "w_out": w_out, "b_out": b_out,
        "H": H, "V": V, "Hp": Hp, "Vp": Vp,
        "vmem_limit_bytes": vmem_limit_bytes,
    }


# ----------------------------------------------------------------------------
# Module-equivalent wrappers.
# ----------------------------------------------------------------------------
def decoder_rnn_decode(packed, tokens, hidden):
    """Run len(tokens) fused decode steps.

    tokens: (T,) int32; hidden: [1, 1, H].
    Returns (log_probs [T, V], hidden [1, 1, H]).
    """
    H, V, Hp = packed["H"], packed["V"], packed["Hp"]
    tokens = jnp.clip(jnp.asarray(tokens, jnp.int32).reshape(-1), 0, V - 1)
    h_pad = jnp.zeros((1, Hp), jnp.float32).at[:, :H].set(
        jnp.asarray(hidden, jnp.float32).reshape(1, H))
    logp_pad, h_new_pad = _decode_steps_pallas(tokens, h_pad, packed)
    return logp_pad[:, 0, :V], h_new_pad[:, :H].reshape(1, 1, H)


def decoder_rnn_forward(packed, token, hidden):
    """Exact DecoderRNN.forward: single token, single step.

    token: scalar int32; hidden: [1, 1, H].  Returns (log_probs [1, V], hidden [1, 1, H]).
    """
    token_arr = jnp.reshape(jnp.asarray(token, jnp.int32), (1,))
    log_probs, new_hidden = decoder_rnn_decode(packed, token_arr, hidden)
    return log_probs, new_hidden


# ----------------------------------------------------------------------------
# Pure-JAX reference (mirrors the kernel's bf16 weight/activation rounding so
# the check stays tight while validating the fused math).
# ----------------------------------------------------------------------------
def decoder_rnn_reference_step(raw, token, hidden, weight_dtype=jnp.bfloat16):
    H = hidden.shape[-1]
    rd = lambda a: a.astype(weight_dtype).astype(jnp.float32)
    x = jnp.maximum(rd(raw["embedding"])[token].reshape(1, H), 0.0)
    h = hidden.reshape(1, H).astype(jnp.float32)

    def split3(w):
        return w[0:H], w[H:2 * H], w[2 * H:3 * H]

    w_ir, w_iz, w_in = split3(rd(raw["w_ih"]))
    w_hr, w_hz, w_hn = split3(rd(raw["w_hh"]))
    b_ir, b_iz, b_in = split3(raw["b_ih"])
    b_hr, b_hz, b_hn = split3(raw["b_hh"])

    xb, hb = rd(x), rd(h)
    r = jax.nn.sigmoid(xb @ w_ir.T + b_ir + hb @ w_hr.T + b_hr)
    z = jax.nn.sigmoid(xb @ w_iz.T + b_iz + hb @ w_hz.T + b_hz)
    n = jnp.tanh(xb @ w_in.T + b_in + r * (hb @ w_hn.T + b_hn))
    h_new = (1.0 - z) * n + z * h
    logits = rd(h_new) @ rd(raw["w_out"]).T + raw["b_out"]
    return jax.nn.log_softmax(logits, axis=1), h_new.reshape(1, 1, H)


if __name__ == "__main__":
    hidden_size = 32
    output_size = 64   # vocabulary size
    T = 8              # decode steps for the fused multi-step check

    key = jax.random.PRNGKey(0)
    pkey, hkey, tkey = jax.random.split(key, 3)
    raw = make_params(pkey, hidden_size, output_size)
    packed = pack_params(raw, hidden_size, output_size)

    hidden = jax.random.normal(hkey, (1, 1, hidden_size), jnp.float32)
    token = jnp.array(5, dtype=jnp.int32)
    tokens = jax.random.randint(tkey, (T,), 0, output_size, dtype=jnp.int32)

    # --- single-step forward (matches DecoderRNN.forward) -------------------
    log_probs, new_hidden = decoder_rnn_forward(packed, token, hidden)
    jax.block_until_ready((log_probs, new_hidden))
    ref_logp, ref_hidden = decoder_rnn_reference_step(raw, token, hidden)
    assert log_probs.shape == (1, output_size)
    assert new_hidden.shape == (1, 1, hidden_size)
    assert jnp.allclose(log_probs, ref_logp, atol=2e-3, rtol=2e-3)
    assert jnp.allclose(new_hidden, ref_hidden.reshape(1, 1, hidden_size), atol=2e-3, rtol=2e-3)

    # --- T-step fused decode (timestep loop inside the kernel) --------------
    logp_seq, h_T = decoder_rnn_decode(packed, tokens, hidden)
    jax.block_until_ready((logp_seq, h_T))
    ref_h, ref_rows = hidden, []
    for t in range(T):
        lp, ref_h = decoder_rnn_reference_step(raw, tokens[t], ref_h)
        ref_rows.append(lp)
    ref_seq = jnp.concatenate(ref_rows, axis=0)
    assert logp_seq.shape == (T, output_size)
    assert jnp.allclose(logp_seq, ref_seq, atol=5e-3, rtol=5e-3)
    assert jnp.allclose(h_T, ref_h, atol=5e-3, rtol=5e-3)

    print("KERNEL_OK")
</pallas_src>

<mosaic_0001>
module attributes {stable_mosaic.version = 11 : i64} {
  func.func @decoder_steps_kernel(%arg0: i32, %arg1: memref<1xi32, #tpu.memory_space<smem>>, %arg2: memref<1x128xf32, #tpu.memory_space<vmem>>, %arg3: memref<1x1x128xbf16, #tpu.memory_space<vmem>>, %arg4: memref<128x384xbf16, #tpu.memory_space<vmem>>, %arg5: memref<128x384xbf16, #tpu.memory_space<vmem>>, %arg6: memref<1x512xf32, #tpu.memory_space<vmem>>, %arg7: memref<128x128xbf16, #tpu.memory_space<vmem>>, %arg8: memref<1x128xf32, #tpu.memory_space<vmem>>, %arg9: memref<1x1x128xf32, #tpu.memory_space<vmem>>, %arg10: memref<1x128xf32, #tpu.memory_space<vmem>>, %arg11: memref<1x128xf32, #tpu.memory_space<vmem>>) attributes {dimension_semantics = [#tpu.dimension_semantics<arbitrary>], iteration_bounds = array<i64: 1>, scalar_prefetch = 1 : i64, scratch_operands = 1 : i64, tpu.core_type = #tpu.core_type<tc>, window_params = [{pipeline_mode = #tpu.pipeline_mode<synchronous>, transform_indices = @transform_0, window_bounds = array<i64: 1, 128>}, {transform_indices = @transform_1, window_bounds = array<i64: 1, 1, 128>}, {pipeline_mode = #tpu.pipeline_mode<synchronous>, transform_indices = @transform_2, window_bounds = array<i64: 128, 384>}, {pipeline_mode = #tpu.pipeline_mode<synchronous>, transform_indices = @transform_3, window_bounds = array<i64: 128, 384>}, {pipeline_mode = #tpu.pipeline_mode<synchronous>, transform_indices = @transform_4, window_bounds = array<i64: 1, 512>}, {pipeline_mode = #tpu.pipeline_mode<synchronous>, transform_indices = @transform_5, window_bounds = array<i64: 128, 128>}, {pipeline_mode = #tpu.pipeline_mode<synchronous>, transform_indices = @transform_6, window_bounds = array<i64: 1, 128>}, {transform_indices = @transform_7, window_bounds = array<i64: 1, 1, 128>}, {pipeline_mode = #tpu.pipeline_mode<synchronous>, transform_indices = @transform_8, window_bounds = array<i64: 1, 128>}]} {
    %c0_i32 = arith.constant 0 : i32
    %0 = arith.cmpi eq, %arg0, %c0_i32 : i32
    %1 = arith.extui %0 : i1 to i32
    %c0_i32_0 = arith.constant 0 : i32
    %2 = arith.cmpi ne, %1, %c0_i32_0 : i32
    scf.if %2 {
      %c0_30 = arith.constant 0 : index
      %c0_31 = arith.constant 0 : index
      %68 = vector.load %arg2[%c0_30, %c0_31] : memref<1x128xf32, #tpu.memory_space<vmem>>, vector<1x128xf32>
      %c0_32 = arith.constant 0 : index
      %c0_33 = arith.constant 0 : index
      %69 = vector.load %arg11[%c0_32, %c0_33] : memref<1x128xf32, #tpu.memory_space<vmem>>, vector<1x128xf32>
      tpu.vector_store %arg11[%c0_32, %c0_33], %68 {strides = array<i32>} : memref<1x128xf32, #tpu.memory_space<vmem>>, vector<1x128xf32>,
    } else {
    }
    %c0 = arith.constant 0 : index
    %c0_1 = arith.constant 0 : index
    %3 = vector.load %arg11[%c0, %c0_1] : memref<1x128xf32, #tpu.memory_space<vmem>>, vector<1x128xf32>
    %c0_2 = arith.constant 0 : index
    %c0_3 = arith.constant 0 : index
    %c0_4 = arith.constant 0 : index
    %4 = vector.load %arg3[%c0_2, %c0_3, %c0_4] : memref<1x1x128xbf16, #tpu.memory_space<vmem>>, vector<1x1x128xbf16>
    %5 = vector.shape_cast %4 : vector<1x1x128xbf16> to vector<1x128xbf16>
    %cst = arith.constant 0.000000e+00 : bf16
    %6 = vector.broadcast %cst : bf16 to vector<1x128xbf16>
    %7 = arith.maximumf %5, %6 : vector<1x128xbf16>
    %c0_5 = arith.constant 0 : index
    %c0_6 = arith.constant 0 : index
    %8 = vector.load %arg4[%c0_5, %c0_6] : memref<128x384xbf16, #tpu.memory_space<vmem>>, vector<128x384xbf16>
    %cst_7 = arith.constant dense<0.000000e+00> : vector<1x384xf32>
    %9 = tpu.matmul %7, %8, %cst_7 {dimension_numbers = #tpu.dot_dimension_numbers<[1], [0], [0], [1], [0, 0, 1, 1], [], []>} : vector<1x128xbf16>, vector<128x384xbf16>, vector<1x384xf32> -> vector<1x384xf32>
    %10 = arith.truncf %3 : vector<1x128xf32> to vector<1x128xbf16>
    %c0_8 = arith.constant 0 : index
    %c0_9 = arith.constant 0 : index
    %11 = vector.load %arg5[%c0_8, %c0_9] : memref<128x384xbf16, #tpu.memory_space<vmem>>, vector<128x384xbf16>
    %cst_10 = arith.constant dense<0.000000e+00> : vector<1x384xf32>
    %12 = tpu.matmul %10, %11, %cst_10 {dimension_numbers = #tpu.dot_dimension_numbers<[1], [0], [0], [1], [0, 0, 1, 1], [], []>} : vector<1x128xbf16>, vector<128x384xbf16>, vector<1x384xf32> -> vector<1x384xf32>
    %c0_11 = arith.constant 0 : index
    %c0_12 = arith.constant 0 : index
    %13 = vector.load %arg6[%c0_11, %c0_12] : memref<1x512xf32, #tpu.memory_space<vmem>>, vector<1x512xf32>
    %14 = vector.extract_strided_slice %9 {offsets = [0, 0], sizes = [1, 128], strides = [1, 1]} : vector<1x384xf32> to vector<1x128xf32>
    %15 = vector.extract_strided_slice %12 {offsets = [0, 0], sizes = [1, 128], strides = [1, 1]} : vector<1x384xf32> to vector<1x128xf32>
    %16 = arith.addf %14, %15 : vector<1x128xf32>
    %17 = vector.extract_strided_slice %13 {offsets = [0, 0], sizes = [1, 128], strides = [1, 1]} : vector<1x512xf32> to vector<1x128xf32>
    %18 = arith.addf %16, %17 : vector<1x128xf32>
    %19 = arith.negf %18 : vector<1x128xf32>
    %20 = math.exp %19 : vector<1x128xf32>
    %cst_13 = arith.constant 1.000000e+00 : f32
    %21 = vector.broadcast %cst_13 : f32 to vector<1x128xf32>
    %22 = arith.addf %21, %20 : vector<1x128xf32>
    %23 = arith.divf %21, %22 : vector<1x128xf32>
    %24 = vector.extract_strided_slice %9 {offsets = [0, 128], sizes = [1, 128], strides = [1, 1]} : vector<1x384xf32> to vector<1x128xf32>
    %25 = vector.extract_strided_slice %12 {offsets = [0, 128], sizes = [1, 128], strides = [1, 1]} : vector<1x384xf32> to vector<1x128xf32>
    %26 = arith.addf %24, %25 : vector<1x128xf32>
    %27 = vector.extract_strided_slice %13 {offsets = [0, 128], sizes = [1, 128], strides = [1, 1]} : vector<1x512xf32> to vector<1x128xf32>
    %28 = arith.addf %26, %27 : vector<1x128xf32>
    %29 = arith.negf %28 : vector<1x128xf32>
    %30 = math.exp %29 : vector<1x128xf32>
    %cst_14 = arith.constant 1.000000e+00 : f32
    %31 = vector.broadcast %cst_14 : f32 to vector<1x128xf32>
    %32 = arith.addf %31, %30 : vector<1x128xf32>
    %33 = arith.divf %31, %32 : vector<1x128xf32>
    %34 = vector.extract_strided_slice %9 {offsets = [0, 256], sizes = [1, 128], strides = [1, 1]} : vector<1x384xf32> to vector<1x128xf32>
    %35 = vector.extract_strided_slice %13 {offsets = [0, 256], sizes = [1, 128], strides = [1, 1]} : vector<1x512xf32> to vector<1x128xf32>
    %36 = arith.addf %34, %35 : vector<1x128xf32>
    %37 = vector.extract_strided_slice %12 {offsets = [0, 256], sizes = [1, 128], strides = [1, 1]} : vector<1x384xf32> to vector<1x128xf32>
    %38 = vector.extract_strided_slice %13 {offsets = [0, 384], sizes = [1, 128], strides = [1, 1]} : vector<1x512xf32> to vector<1x128xf32>
    %39 = arith.addf %37, %38 : vector<1x128xf32>
    %40 = arith.mulf %23, %39 : vector<1x128xf32>
    %41 = arith.addf %36, %40 : vector<1x128xf32>
    %42 = math.tanh %41 : vector<1x128xf32>
    %cst_15 = arith.constant 1.000000e+00 : f32
    %43 = vector.broadcast %cst_15 : f32 to vector<1x128xf32>
    %44 = arith.subf %43, %33 : vector<1x128xf32>
    %45 = arith.mulf %44, %42 : vector<1x128xf32>
    %46 = arith.mulf %33, %3 : vector<1x128xf32>
    %47 = arith.addf %45, %46 : vector<1x128xf32>
    %c0_16 = arith.constant 0 : index
    %c0_17 = arith.constant 0 : index
    %48 = vector.load %arg11[%c0_16, %c0_17] : memref<1x128xf32, #tpu.memory_space<vmem>>, vector<1x128xf32>
    tpu.vector_store %arg11[%c0_16, %c0_17], %47 {strides = array<i32>} : memref<1x128xf32, #tpu.memory_space<vmem>>, vector<1x128xf32>,
    %c0_18 = arith.constant 0 : index
    %c0_19 = arith.constant 0 : index
    %49 = vector.load %arg10[%c0_18, %c0_19] : memref<1x128xf32, #tpu.memory_space<vmem>>, vector<1x128xf32>
    tpu.vector_store %arg10[%c0_18, %c0_19], %47 {strides = array<i32>} : memref<1x128xf32, #tpu.memory_space<vmem>>, vector<1x128xf32>,
    %50 = arith.truncf %47 : vector<1x128xf32> to vector<1x128xbf16>
    %c0_20 = arith.constant 0 : index
    %c0_21 = arith.constant 0 : index
    %51 = vector.load %arg7[%c0_20, %c0_21] : memref<128x128xbf16, #tpu.memory_space<vmem>>, vector<128x128xbf16>
    %cst_22 = arith.constant dense<0.000000e+00> : vector<1x128xf32>
    %52 = tpu.matmul %50, %51, %cst_22 {dimension_numbers = #tpu.dot_dimension_numbers<[1], [0], [0], [1], [0, 0, 1, 1], [], []>} : vector<1x128xbf16>, vector<128x128xbf16>, vector<1x128xf32> -> vector<1x128xf32>
    %c0_23 = arith.constant 0 : index
    %c0_24 = arith.constant 0 : index
    %53 = vector.load %arg8[%c0_23, %c0_24] : memref<1x128xf32, #tpu.memory_space<vmem>>, vector<1x128xf32>
    %54 = arith.addf %52, %53 : vector<1x128xf32>
    %cst_25 = arith.constant dense<0xFF800000> : vector<1xf32>
    %55 = vector.multi_reduction <maximumf>, %54, %cst_25 [1] : vector<1x128xf32> to vector<1xf32>
    %56 = vector.shape_cast %55 : vector<1xf32> to vector<1x1xf32>
    %57 = vector.broadcast %56 : vector<1x1xf32> to vector<1x128xf32>
    %58 = arith.subf %54, %57 : vector<1x128xf32>
    %59 = math.exp %58 : vector<1x128xf32>
    %cst_26 = arith.constant dense<0.000000e+00> : vector<1xf32>
    %60 = vector.multi_reduction <add>, %59, %cst_26 [1] : vector<1x128xf32> to vector<1xf32>
    %61 = vector.shape_cast %60 : vector<1xf32> to vector<1x1xf32>
    %62 = math.log %61 : vector<1x1xf32>
    %63 = vector.broadcast %62 : vector<1x1xf32> to vector<1x128xf32>
    %64 = arith.subf %58, %63 : vector<1x128xf32>
    %c0_27 = arith.constant 0 : index
    %c0_28 = arith.constant 0 : index
    %c0_29 = arith.constant 0 : index
    %65 = vector.load %arg9[%c0_27, %c0_28, %c0_29] : memref<1x1x128xf32, #tpu.memory_space<vmem>>, vector<1x1x128xf32>
    %66 = vector.shape_cast %65 : vector<1x1x128xf32> to vector<1x128xf32>
    %67 = vector.shape_cast %64 : vector<1x128xf32> to vector<1x1x128xf32>
    tpu.vector_store %arg9[%c0_27, %c0_28, %c0_29], %67 {strides = array<i32>} : memref<1x1x128xf32, #tpu.memory_space<vmem>>, vector<1x1x128xf32>,
    return
  }
  func.func @transform_0(%arg0: i32, %arg1: memref<1xi32, #tpu.memory_space<smem>>) -> (i32, i32) {
    %c0_i32 = arith.constant 0 : i32
    %c0_i32_0 = arith.constant 0 : i32
    %c0_i32_1 = arith.constant 0 : i32
    return %c0_i32, %c0_i32_0 : i32, i32
  }
  func.func @transform_1(%arg0: i32, %arg1: memref<1xi32, #tpu.memory_space<smem>>) -> (i32, i32, i32) {
    %0 = arith.index_cast %arg0 : i32 to index
    %1 = memref.load %arg1[%0] : memref<1xi32, #tpu.memory_space<smem>>
    %c0_i32 = arith.constant 0 : i32
    %c0_i32_0 = arith.constant 0 : i32
    %c0_i32_1 = arith.constant 0 : i32
    return %1, %c0_i32, %c0_i32_0 : i32, i32, i32
  }
  func.func @transform_2(%arg0: i32, %arg1: memref<1xi32, #tpu.memory_space<smem>>) -> (i32, i32) {
    %c0_i32 = arith.constant 0 : i32
    %c0_i32_0 = arith.constant 0 : i32
    %c0_i32_1 = arith.constant 0 : i32
    return %c0_i32, %c0_i32_0 : i32, i32
  }
  func.func @transform_3(%arg0: i32, %arg1: memref<1xi32, #tpu.memory_space<smem>>) -> (i32, i32) {
    %c0_i32 = arith.constant 0 : i32
    %c0_i32_0 = arith.constant 0 : i32
    %c0_i32_1 = arith.constant 0 : i32
    return %c0_i32, %c0_i32_0 : i32, i32
  }
  func.func @transform_4(%arg0: i32, %arg1: memref<1xi32, #tpu.memory_space<smem>>) -> (i32, i32) {
    %c0_i32 = arith.constant 0 : i32
    %c0_i32_0 = arith.constant 0 : i32
    %c0_i32_1 = arith.constant 0 : i32
    return %c0_i32, %c0_i32_0 : i32, i32
  }
  func.func @transform_5(%arg0: i32, %arg1: memref<1xi32, #tpu.memory_space<smem>>) -> (i32, i32) {
    %c0_i32 = arith.constant 0 : i32
    %c0_i32_0 = arith.constant 0 : i32
    %c0_i32_1 = arith.constant 0 : i32
    return %c0_i32, %c0_i32_0 : i32, i32
  }
  func.func @transform_6(%arg0: i32, %arg1: memref<1xi32, #tpu.memory_space<smem>>) -> (i32, i32) {
    %c0_i32 = arith.constant 0 : i32
    %c0_i32_0 = arith.constant 0 : i32
    %c0_i32_1 = arith.constant 0 : i32
    return %c0_i32, %c0_i32_0 : i32, i32
  }
  func.func @transform_7(%arg0: i32, %arg1: memref<1xi32, #tpu.memory_space<smem>>) -> (i32, i32, i32) {
    %c0_i32 = arith.constant 0 : i32
    %c0_i32_0 = arith.constant 0 : i32
    %c0_i32_1 = arith.constant 0 : i32
    return %arg0, %c0_i32, %c0_i32_0 : i32, i32, i32
  }
  func.func @transform_8(%arg0: i32, %arg1: memref<1xi32, #tpu.memory_space<smem>>) -> (i32, i32) {
    %c0_i32 = arith.constant 0 : i32
    %c0_i32_0 = arith.constant 0 : i32
    %c0_i32_1 = arith.constant 0 : i32
    return %c0_i32, %c0_i32_0 : i32, i32
  }
}

</mosaic_0001>

<bundles_post_ra>
// kernel: tpu_custom_call.1
= control target key start
LH: loop header
LB: loop body
LE: loop exit
PB: predicated region body
PF: predicated region fallthrough
CT: control target
= control target key end

     0   :  { %16 = vsyncpa [#allocation6], 0  ;;  %s1295_s0 = inlined_call_operand.<no memory space> [shape: s32[1], index: 0, kind: input, shape index: {}]   ;;  %s1296_s1 = inlined_call_operand.vmem [shape: f32[1,128], index: 1, kind: input, shape index: {}]   ;;  %s1297_s2 = inlined_call_operand.vmem [shape: bf16[128,1,128], index: 2, kind: input, shape index: {}]   ;;  %s1298_s3 = inlined_call_operand.vmem [shape: bf16[128,384], index: 3, kind: input, shape index: {}]   ;;  %s1299_s4 = inlined_call_operand.hbm [shape: bf16[128,384], index: 4, kind: input, shape index: {}]   ;;  %s1300_s5 = inlined_call_operand.vmem [shape: f32[1,512], index: 5, kind: input, shape index: {}]   ;;  %s1301_s6 = inlined_call_operand.hbm [shape: bf16[128,128], index: 6, kind: input, shape index: {}]   ;;  %s1302_s7 = inlined_call_operand.vmem [shape: f32[1,128], index: 7, kind: input, shape index: {}]   ;;  %s1303_s8 = inlined_call_operand.hbm [shape: f32[1,1,128], index: 8, kind: output, shape index: {0}]   ;;  %s1304_s9 = inlined_call_operand.hbm [shape: f32[1,128], index: 9, kind: output, shape index: {1}]  }
   0x1   :  { %17 = vsyncpa [#allocation9], 0 }
   0x2   :  { %18 = vsyncpa [#allocation7], 0 }
   0x3   :  { %19 = vsyncpa [#allocation12], 0  ;;  %s1094_s30 = smov [#allocation5]  }
   0x4   :  { %s36_s10 = sshll.u32 %s1094_s30, 4  ;;  %s37_s10 = int_to_ptr.vmem [resolvable:$true] %s36_s10 }
   0x5   :  { %s1014_s11 = scalar_lea.vmem %s37_s10, 3072  ;;  %p1019_p1 = scmp.lt.s32.totalorder %s37_s10, %s37_s10 }
   0x6   :  { %p1015_p0 = scmp.ne.s32.totalorder %s37_s10, %s1014_s11  ;;  %p1020_p2 = scmp.lt.s32.totalorder %s1014_s11, %s1014_s11 }
   0x8   :  { %p1021_p3 = por %p1020_p2, %p1019_p1 }
   0xa   :  { %p1022_p4 = pnand %p1021_p3, %p1015_p0 }
   0xc   :  { %1025 = shalt.err (!%p1022_p4)
}
   0xd   :  { %s1095_s12 = smov 192   ;;  %s1096_s13 = smov 12  }
   0xe   :  { %42 = dma.hbm_to_vmem [thread:$0]  %s1299_s4, 3072, %s37_s10, [#allocation6], %s1095_s12, %s1095_s12, %s1096_s13  }
   0xf   :  { %s1097_s16 = smov [#allocation8]  }
  0x10   :  { %s50_s17 = sshll.u32 %s1097_s16, 4  ;;  %s51_s17 = int_to_ptr.vmem [resolvable:$true] %s50_s17 }
  0x11   :  { %s1034_s18 = scalar_lea.vmem %s51_s17, 1024  ;;  %p1039_p6 = scmp.lt.s32.totalorder %s51_s17, %s51_s17 }
  0x12   :  { %p1035_p5 = scmp.ne.s32.totalorder %s51_s17, %s1034_s18  ;;  %p1040_p7 = scmp.lt.s32.totalorder %s1034_s18, %s1034_s18 }
  0x14   :  { %p1041_p8 = por %p1040_p7, %p1039_p6 }
  0x16   :  { %p1042_p9 = pnand %p1041_p8, %p1035_p5 }
  0x18   :  { %1045 = shalt.err (!%p1042_p9)
}
  0x19   :  { %s1098_s19 = smov 64   ;;  %s1099_s20 = smov 4  }
  0x1a   :  { %56 = dma.hbm_to_vmem [thread:$0]  %s1301_s6, 1024, %s51_s17, [#allocation9], %s1098_s19, %s1098_s19, %s1099_s20  }
  0x1b   :  { %1086 = dma.done.wait [#allocation6], 3072  }
  0x1c   :  { %1087 = vsyncadd [#allocation6], 4294964224 }
  0x1d   :  { %1088 = dma.done.wait [#allocation9], 1024  }
  0x1e   :  { %1089 = vsyncadd [#allocation9], 4294966272  ;;  %v1100_v0 = vmov 0.0   ;;  %v1101_v1 = vmov 0   ;;  %vm1102_vm0 = vmmov 0   ;;  %p70_p10 = scmp.lt.s32.totalorder %s1295_s0, 127 }
  0x1f   :  { %849 = vmatprep.subr.bf16.mxu1 %v1100_v0  ;;  %276 = vmatprep.mubr.bf16.mxu0 %v1101_v1  ;;  %v920_v2 = vld [vmem:[%s1298_s3 + $0xac] ss:$12 sps:$4 sm:$0xff]   ;;  %v922_v3 = vld [vmem:[%s1298_s3 + $0xa8] ss:$12 sps:$4 sm:$0xff]   ;;  %v925_v5 = vld [vmem:[%s1298_s3 + $0x90] ss:$12 sps:$4 sm:$0xff]  }
  0x20   :  { %865 = vmatprep.mubr.msk.bf16.mxu1 %vm1102_vm0, %v1100_v0  ;;  %244 = vmatprep.subr.bf16.mxu0 %v920_v2  ;;  %v923_v4 = vld [vmem:[%s1298_s3 + $0x94] ss:$12 sps:$4 sm:$0xff]   ;;  %v926_v6 = vld [vmem:[%s1298_s3 + $0x7c] ss:$12 sps:$4 sm:$0xff]   ;;  %v928_v7 = vld [vmem:[%s1298_s3 + $0x78] ss:$12 sps:$4 sm:$0xff]  }
  0x21   :  { %245 = vmatpush1.bf16.msra.mxu0 %v922_v3  ;;  %v929_v8 = vld [vmem:[%s1298_s3 + $0x64] ss:$12 sps:$4 sm:$0xff]   ;;  %v931_v9 = vld [vmem:[%s1298_s3 + $0x60] ss:$12 sps:$4 sm:$0xff]   ;;  %v934_v13 = vld [vmem:[%s1298_s3 + $0x48] ss:$12 sps:$4 sm:$0xff]  }
  0x22   :  { %246 = vmatprep.subr.bf16.mxu0 %v923_v4  ;;  %v944_v10 = vld [vmem:[%s1298_s3 + $0xb0] ss:$12 sps:$4 sm:$0xff]   ;;  %v932_v11 = vld [vmem:[%s1298_s3 + $0x4c] ss:$12 sps:$4 sm:$0xff]   ;;  %v935_v14 = vld [vmem:[%s1298_s3 + $0x34] ss:$12 sps:$4 sm:$0xff]  }
  0x23   :  { %850 = vmatpush3.bf16.msra.mxu1 %v944_v10  ;;  %v948_v12 = vld [vmem:[%s1298_s3 + $0x98] ss:$12 sps:$4 sm:$0xff]   ;;  %v952_v15 = vld [vmem:[%s1298_s3 + $0x80] ss:$12 sps:$4 sm:$0xff]   ;;  %v937_v16 = vld [vmem:[%s1298_s3 + $0x30] ss:$12 sps:$4 sm:$0xff]  }
  0x24   :  { %851 = vmatprep.subr.bf16.mxu1 %v1100_v0  ;;  %s1306_s0 = smov (!%p70_p10, %s1295_s0), 127  ;;  %v938_v17 = vld [vmem:[%s1298_s3 + $0x1c] ss:$12 sps:$4 sm:$0xff]   ;;  %v940_v19 = vld [vmem:[%s1298_s3 + $0x18] ss:$12 sps:$4 sm:$0xff]   ;;  %vm717_vm1 = vcmask 1040384  }
  0x25   :  { %247 = vmatpush1.bf16.msra.mxu0 %v925_v5  ;;  %v956_v18 = vld [vmem:[%s1298_s3 + $0x68] ss:$12 sps:$4 sm:$0xff]   ;;  %v941_v20 = vld [vmem:[%s1298_s3 + $0x4] ss:$12 sps:$4 sm:$0xff]   ;;  %s72_s21 = scalar_lea.vmem %s1297_s2, %s1306_s0  ;;  %v943_v22 = vld [vmem:[%s1298_s3] ss:$12 sps:$4 sm:$0xff]  }
  0x26   :  { %248 = vmatprep.subr.bf16.mxu0 %v926_v6  ;;  %v960_v21 = vld [vmem:[%s1298_s3 + $0x50] ss:$12 sps:$4 sm:$0xff]   ;;  %v82_v23 = vld [vmem:[%s72_s21] sm:$0x1]  ;;  %v964_v25 = vld [vmem:[%s1298_s3 + $0x38] ss:$12 sps:$4 sm:$0xff]  }
  0x27   :  { %852 = vmatpush3.bf16.msra.mxu1 %v948_v12  ;;  %v947_v24 = vld [vmem:[#allocation5 + $0xac] ss:$12 sps:$4 sm:$0xff]   ;;  %v83_v26 = vmax.bf16 %v1101_v1, %v82_v23  ;;  %v79_v27 = vld [vmem:[%s1296_s1] sm:$0x1]  ;;  %v945_v28 = vld [vmem:[#allocation5 + $0xa8] ss:$12 sps:$4 sm:$0xff]  }
  0x28   :  { %853 = vmatprep.subr.bf16.mxu1 %v1100_v0  ;;  %80 = vst [vmem:[#allocation2] sm:$0x1] %v79_v27  ;;  %v951_v29 = vld [vmem:[#allocation5 + $0x94] ss:$12 sps:$4 sm:$0xff]   ;;  %v949_v31 = vld [vmem:[#allocation5 + $0x90] ss:$12 sps:$4 sm:$0xff]  }
  0x29   :  { %249 = vmatpush1.bf16.msra.mxu0 %v928_v7  ;;  %v968_v30 = vld [vmem:[%s1298_s3 + $0x20] ss:$12 sps:$4 sm:$0xff]   ;;  %v953_v33 = vld [vmem:[#allocation5 + $0x78] ss:$12 sps:$4 sm:$0xff]   ;;  %v985_v56 = vld [vmem:[#allocation8 + $0x30] sm:$0xff]   ;;  %s1103_s10 = smov [#allocation11]  }
  0x2a   :  { %250 = vmatprep.subr.bf16.mxu0 %v929_v8  ;;  %v955_v32 = vld [vmem:[#allocation5 + $0x7c] ss:$12 sps:$4 sm:$0xff]   ;;  %v959_v35 = vld [vmem:[#allocation5 + $0x64] ss:$12 sps:$4 sm:$0xff]   ;;  %v957_v37 = vld [vmem:[#allocation5 + $0x60] ss:$12 sps:$4 sm:$0xff]   ;;  %v578_v8 = vlaneseq }
  0x2b   :  { %854 = vmatpush3.bf16.msra.mxu1 %v952_v15  ;;  %v972_v34 = vld [vmem:[%s1298_s3 + $0x8] ss:$12 sps:$4 sm:$0xff]   ;;  %v963_v38 = vld [vmem:[#allocation5 + $0x4c] ss:$12 sps:$4 sm:$0xff]   ;;  %v567_v10 = vld [vmem:[%s1300_s5] sm:$0xf] }
  0x2c   :  { %855 = vmatprep.subr.bf16.mxu1 %v1100_v0  ;;  %v976_v36 = vld [vmem:[#allocation5 + $0xb0] ss:$12 sps:$4 sm:$0xff]   ;;  %v977_v39 = vld [vmem:[#allocation5 + $0x98] ss:$12 sps:$4 sm:$0xff]   ;;  %v961_v40 = vld [vmem:[#allocation5 + $0x48] ss:$12 sps:$4 sm:$0xff]  }
  0x2d   :  { %251 = vmatpush1.bf16.msra.mxu0 %v931_v9  ;;  %v967_v41 = vld [vmem:[#allocation5 + $0x34] ss:$12 sps:$4 sm:$0xff]   ;;  %v965_v43 = vld [vmem:[#allocation5 + $0x30] ss:$12 sps:$4 sm:$0xff]   ;;  %v969_v46 = vld [vmem:[#allocation5 + $0x18] ss:$12 sps:$4 sm:$0xff]  }
  0x2e   :  { %252 = vmatprep.subr.bf16.mxu0 %v932_v11  ;;  %v978_v42 = vld [vmem:[#allocation5 + $0x80] ss:$12 sps:$4 sm:$0xff]   ;;  %v971_v44 = vld [vmem:[#allocation5 + $0x1c] ss:$12 sps:$4 sm:$0xff]   ;;  %v975_v47 = vld [vmem:[#allocation5 + $0x4] ss:$12 sps:$4 sm:$0xff]  }
  0x2f   :  { %856 = vmatpush3.bf16.msra.mxu1 %v956_v18  ;;  %v979_v45 = vld [vmem:[#allocation5 + $0x68] ss:$12 sps:$4 sm:$0xff]   ;;  %v980_v48 = vld [vmem:[#allocation5 + $0x50] ss:$12 sps:$4 sm:$0xff]   ;;  %v973_v49 = vld [vmem:[#allocation5] ss:$12 sps:$4 sm:$0xff]  }
  0x30   :  { %857 = vmatprep.subr.bf16.mxu1 %v1100_v0  ;;  %v1265_v50 = vld [vmem:[#allocation2] sm:$0x1]  ;;  %v981_v51 = vld [vmem:[#allocation5 + $0x38] ss:$12 sps:$4 sm:$0xff]   ;;  %v982_v53 = vld [vmem:[#allocation5 + $0x20] ss:$12 sps:$4 sm:$0xff]  }
  0x31   :  { %253 = vmatpush1.bf16.msra.mxu0 %v934_v13  ;;  %v325_v52 = vpack.c.bf16 %v1265_v50, %v1265_v50  ;;  %v983_v54 = vld [vmem:[#allocation5 + $0x8] ss:$12 sps:$4 sm:$0xff]   ;;  %v984_v55 = vld [vmem:[#allocation8 + $0x38] sm:$0xff]   ;;  %v987_v58 = vld [vmem:[#allocation8 + $0x20] sm:$0xff]   ;;  %v579_v9 = vshrl.u32 %v578_v8, 7  ;;  %s747_s11 = sshll.u32 %s1103_s10, 4  ;;  %s748_s11 = int_to_ptr.vmem [resolvable:$true] %s747_s11 }
  0x32   :  { %254 = vmatprep.subr.bf16.mxu0 %v935_v14  ;;  %v986_v57 = vld [vmem:[#allocation8 + $0x28] sm:$0xff]   ;;  %v988_v59 = vld [vmem:[#allocation8 + $0x18] sm:$0xff]   ;;  %v989_v60 = vld [vmem:[#allocation8 + $0x10] sm:$0xff]   ;;  %s1046_s12 = scalar_lea.vmem %s748_s11, 16  ;;  %p1051_p12 = scmp.lt.s32.totalorder %s748_s11, %s748_s11 }
  0x33   :  { %858 = vmatpush3.bf16.msra.mxu1 %v960_v21  ;;  %v990_v61 = vld [vmem:[#allocation8 + $0x8] sm:$0xff]   ;;  %v991_v62 = vld [vmem:[#allocation8] sm:$0xff]   ;;  %v580_v13 = vsub.s32 1, %v579_v9  ;;  %p1047_p11 = scmp.ne.s32.totalorder %s748_s11, %s1046_s12 }
  0x34   :  { %859 = vmatprep.subr.bf16.mxu1 %v1100_v0 }
  0x35   :  { %255 = vmatpush1.bf16.msra.mxu0 %v937_v16  ;;  %v581_v18 = vrot.slane %v567_v10, %v580_v13 }
  0x36   :  { %256 = vmatprep.subr.bf16.mxu0 %v938_v17 }
  0x37   :  { %860 = vmatpush3.bf16.msra.mxu1 %v964_v25 }
  0x38   :  { %861 = vmatprep.subr.bf16.mxu1 %v1100_v0 }
  0x39   :  { %257 = vmatpush1.bf16.msra.mxu0 %v940_v19 }
  0x3a   :  { %258 = vmatprep.subr.bf16.mxu0 %v941_v20 }
  0x3b   :  { %862 = vmatpush3.bf16.msra.mxu1 %v968_v30 }
  0x3c   :  { %863 = vmatprep.subr.bf16.mxu1 %v1100_v0 }
  0x3d   :  { %259 = vmatpush1.bf16.msra.mxu0 %v943_v22 }
  0x3e   :  { %486 = vmatprep.subr.bf16.mxu0 %v947_v24 }
  0x3f   :  { %864 = vmatpush3.bf16.msra.mxu1 %v972_v34 }
  0x40   :  { %277 = vmatmul.mubr.bf16.vlgmr.msra.gmra.mxu0 %v83_v26  ;;  %869 = vmatprep.subr.bf16.mxu1 %v1100_v0 }
  0x41   :  { %487 = vmatpush1.bf16.msra.mxu0 %v945_v28  ;;  %518 = vmatprep.mubr.bf16.mxu0 %v1101_v1  ;;  %v598_v28 = vsub.s32 3, %v579_v9 }
  0x42   :  { %488 = vmatprep.subr.bf16.mxu0 %v951_v29  ;;  %866 = vmatmul.mubr.bf16.vlgmr.msra.gmra.mxu1 %v83_v26  ;;  %v592_v29 = vsub.s32 2, %v579_v9 }
  0x43   :  { %870 = vmatpush3.bf16.msra.mxu1 %v976_v36  ;;  %885 = vmatprep.mubr.msk.bf16.mxu1 %vm1102_vm0, %v1100_v0  ;;  %v599_v30 = vrot.slane %v567_v10, %v598_v28 }
  0x44   :  { %871 = vmatprep.subr.bf16.mxu1 %v1100_v0 }
  0x45   :  { %489 = vmatpush1.bf16.msra.mxu0 %v949_v31 }
  0x46   :  { %490 = vmatprep.subr.bf16.mxu0 %v955_v32  ;;  %v593_v32 = vrot.slane %v567_v10, %v592_v29 }
  0x47   :  { %872 = vmatpush3.bf16.msra.mxu1 %v977_v39 }
  0x48   :  { %873 = vmatprep.subr.bf16.mxu1 %v1100_v0 }
  0x49   :  { %491 = vmatpush1.bf16.msra.mxu0 %v953_v33 }
  0x4a   :  { %492 = vmatprep.subr.bf16.mxu0 %v959_v35 }
  0x4b   :  { %874 = vmatpush3.bf16.msra.mxu1 %v978_v42 }
  0x4c   :  { %875 = vmatprep.subr.bf16.mxu1 %v1100_v0 }
  0x4d   :  { %493 = vmatpush1.bf16.msra.mxu0 %v957_v37 }
  0x4e   :  { %494 = vmatprep.subr.bf16.mxu0 %v963_v38 }
  0x4f   :  { %876 = vmatpush3.bf16.msra.mxu1 %v979_v45 }
  0x50   :  { %877 = vmatprep.subr.bf16.mxu1 %v1100_v0 }
  0x51   :  { %495 = vmatpush1.bf16.msra.mxu0 %v961_v40 }
  0x52   :  { %496 = vmatprep.subr.bf16.mxu0 %v967_v41 }
  0x53   :  { %878 = vmatpush3.bf16.msra.mxu1 %v980_v48 }
  0x54   :  { %879 = vmatprep.subr.bf16.mxu1 %v1100_v0 }
  0x55   :  { %497 = vmatpush1.bf16.msra.mxu0 %v965_v43 }
  0x56   :  { %498 = vmatprep.subr.bf16.mxu0 %v971_v44 }
  0x57   :  { %880 = vmatpush3.bf16.msra.mxu1 %v981_v51 }
  0x58   :  { %881 = vmatprep.subr.bf16.mxu1 %v1100_v0 }
  0x59   :  { %499 = vmatpush1.bf16.msra.mxu0 %v969_v46  ;;  %v628_v46 = vld [vmem:[%s1302_s7] sm:$0x1]  ;;  %s1050_s7 = scalar_lea.vmem %s748_s11, 32 }
  0x5a   :  { %500 = vmatprep.subr.bf16.mxu0 %v975_v47  ;;  %p1052_p13 = scmp.lt.s32.totalorder %s1050_s7, %s1046_s12 }
  0x5b   :  { %882 = vmatpush3.bf16.msra.mxu1 %v982_v53 }
  0x5c   :  { %883 = vmatprep.subr.bf16.mxu1 %v1100_v0  ;;  %p1053_p0 = por %p1052_p13, %p1051_p12 }
  0x5d   :  { %501 = vmatpush1.bf16.msra.mxu0 %v973_v49 }
  0x5e   :  { %889 = vmatprep.subr.bf16.mxu0 %v1100_v0  ;;  %p1054_p1 = pnand %p1053_p0, %p1047_p11 }
  0x5f   :  { %884 = vmatpush3.bf16.msra.mxu1 %v983_v54 }
  0x60   :  { %519 = vmatmul.mubr.bf16.vlgmr.msra.gmra.mxu0 %v325_v52 }
  0x61   :  { %905 = vmatprep.mubr.msk.bf16.mxu0 %vm1102_vm0, %v1100_v0  ;;  %890 = vmatpush3.bf16.msra.mxu0 %v984_v55 }
  0x62   :  { %886 = vmatmul.mubr.bf16.vlgmr.msra.gmra.mxu1 %v325_v52  ;;  %891 = vmatprep.subr.bf16.mxu0 %v1100_v0 }
  0x65   :  { %892 = vmatpush3.bf16.msra.mxu0 %v985_v56 }
  0x66   :  { %893 = vmatprep.subr.bf16.mxu0 %v1100_v0 }
  0x69   :  { %894 = vmatpush3.bf16.msra.mxu0 %v986_v57 }
  0x6a   :  { %895 = vmatprep.subr.bf16.mxu0 %v1100_v0 }
  0x6d   :  { %896 = vmatpush3.bf16.msra.mxu0 %v987_v58 }
  0x6e   :  { %897 = vmatprep.subr.bf16.mxu0 %v1100_v0 }
  0x71   :  { %898 = vmatpush3.bf16.msra.mxu0 %v988_v59 }
  0x72   :  { %899 = vmatprep.subr.bf16.mxu0 %v1100_v0 }
  0x75   :  { %900 = vmatpush3.bf16.msra.mxu0 %v989_v60 }
  0x76   :  { %901 = vmatprep.subr.bf16.mxu0 %v1100_v0 }
  0x79   :  { %902 = vmatpush3.bf16.msra.mxu0 %v990_v61 }
  0x7a   :  { %903 = vmatprep.subr.bf16.mxu0 %v1100_v0 }
  0x7d   :  { %904 = vmatpush3.bf16.msra.mxu0 %v991_v62 }
 0x100   :  { %v278_v63 = vpop.f32.mrf.mxu0 }
 0x102   :  { %v280_v1 = vpop.f32.mrf.mxu0  ;;  %v319_v4 = vpop.f32.mrf.mxu1 }
 0x103   :  { %v595_v36 = vadd.f32 %v593_v32, %v319_v4 }
 0x104   :  { %v282_v2 = vpop.f32.mrf.mxu0  ;;  %v867_v5 = vpop.f32.mrf.mxu1 }
 0x106   :  { %v283_v3 = vpop.f32.mrf.mxu0  ;;  %v322_v6 = vpop.f32.mrf.mxu1 }
 0x108   :  { %v868_v7 = vpop.f32.mrf.mxu1 }
 0x120   :  { %v520_v11 = vpop.f32.mrf.mxu0 }
 0x121   :  { %v568_v12 = vadd.f32 %v520_v11, %v278_v63 }
 0x122   :  { %v522_v14 = vpop.f32.mrf.mxu0  ;;  %v561_v21 = vpop.f32.mrf.mxu1 }
 0x123   :  { %v569_v0 = vadd.f32 %v568_v12, %v567_v10  ;;  %v576_v17 = vadd.f32 %v522_v14, %v280_v1  ;;  %v601_v34 = vadd.f32 %v599_v30, %v561_v21 }
 0x124   :  { %v524_v15 = vpop.f32.mrf.mxu0  ;;  %v887_v22 = vpop.f32.mrf.mxu1 }
 0x125   :  { %v812_v16 = vmul.f32 -1.442695, %v569_v0  ;;  %v583_v20 = vadd.f32 %v581_v18, %v576_v17 }
 0x126   :  { %v525_v19 = vpop.f32.mrf.mxu0  ;;  %v564_v24 = vpop.f32.mrf.mxu1 }
 0x127   :  { %992 = vpow2.f32 %v812_v16  ;;  %v813_v23 = vmul.f32 -1.442695, %v583_v20 }
 0x128   :  { %v888_v25 = vpop.f32.mrf.mxu1 }
 0x129   :  { %994 = vpow2.f32 %v813_v23 }
 0x134   :  { %v993_v26 = vpop.eup %992 }
 0x135   :  { %v573_v27 = vadd.f32 1.0, %v993_v26 }
 0x136   :  { %v995_v31 = vpop.eup %994 }
 0x137   :  { %996 = vrcp.f32 %v573_v27  ;;  %v587_v33 = vadd.f32 1.0, %v995_v31 }
 0x139   :  { %998 = vrcp.f32 %v587_v33 }
 0x144   :  { %v997_v35 = vpop.eup %996 }
 0x145   :  { %v602_v37 = vmul.f32 %v997_v35, %v601_v34 }
 0x146   :  { %v999_v39 = vpop.eup %998 }
 0x147   :  { %v603_v38 = vadd.f32 %v602_v37, %v595_v36  ;;  %v605_v40 = vsub.f32 1.0, %v999_v39  ;;  %v607_v43 = vmul.f32 %v999_v39, %v1265_v50 }
 0x149   :  { %1000 = vtanh.f32 %v603_v38 }
 0x156   :  { %v1001_v41 = vpop.eup %1000 }
 0x157   :  { %v606_v42 = vmul.f32 %v1001_v41, %v605_v40 }
 0x159   :  { %v608_v44 = vadd.f32 %v607_v43, %v606_v42 }
 0x15b   :  { %609 = vst [vmem:[#allocation2] sm:$0x1] %v608_v44  ;;  %v611_v45 = vpack.c.bf16 %v608_v44, %v608_v44  ;;  %610 = vst [vmem:[#allocation11] sm:$0x1] %v608_v44 }
 0x15d   :  { %906 = vmatmul.mubr.bf16.vlgmr.msra.gmra.mxu0 %v611_v45 }
 0x21d   :  { %v711_v47 = vpop.f32.mrf.mxu0 }
 0x21e   :  { %v712_v48 = vadd.f32 %v711_v47, %v628_v46 }
 0x21f   :  { %v907_v49 = vpop.f32.mrf.mxu0 }
 0x220   :  { %v718_v51 = vsel %vm717_vm1, %v712_v48, -inf }
 0x221   :  { %719 = vmax.xlane.f32.xlu0 %v718_v51  ;;  %v714_v52 = vpop.f32.mrf.mxu0 }
 0x223   :  { %v908_v53 = vpop.f32.mrf.mxu0 }
 0x2aa   :  { %v720_v54 = vpop.xlane.xlu0 %719 }
 0x2ab   :  { %v721_v55 = vsub.f32 %v712_v48, %v720_v54 }
 0x2ad   :  { %v722_v50 = vmul.f32 1.442695, %v721_v55 }
 0x2af   :  { %1002 = vpow2.f32 %v722_v50 }
 0x2bc   :  { %v1003_v56 = vpop.eup %1002 }
 0x2bd   :  { %v724_v57 = vsel %vm717_vm1, %v1003_v56, 0.0 }
 0x2be   :  { %725 = vadd.xlane.f32.xlu0 %v724_v57 }
 0x2bf   :  { %1057 = shalt.err (!%p1054_p1)
}
 0x2c0   :  { %750 = dma.vmem_to_hbm [thread:$0]  %s748_s11, 16, %s1304_s9, [#allocation12]  }
 0x2c1   :  { %s1104_s15 = smov [#allocation10]  }
 0x2c2   :  { %s737_s16 = sshll.u32 %s1104_s15, 4  ;;  %s738_s16 = int_to_ptr.vmem [resolvable:$true] %s737_s16 }
 0x2c3   :  { %s1066_s17 = scalar_lea.vmem %s738_s16, 16  ;;  %s1070_s18 = scalar_lea.vmem %s738_s16, 32 }
 0x2c4   :  { %p1067_p2 = scmp.ne.s32.totalorder %s738_s16, %s1066_s17  ;;  %p1071_p3 = scmp.lt.s32.totalorder %s738_s16, %s738_s16 }
 0x2c5   :  { %p1072_p4 = scmp.lt.s32.totalorder %s1070_s18, %s1066_s17 }
 0x2c7   :  { %p1073_p5 = por %p1072_p4, %p1071_p3 }
 0x2c9   :  { %p1074_p6 = pnand %p1073_p5, %p1067_p2 }
 0x347   :  { %v726_v58 = vpop.xlane.xlu0 %725 }
 0x348   :  { %1004 = vlog2.f32 %v726_v58 }
 0x355   :  { %v1005_v59 = vpop.eup %1004 }
 0x356   :  { %v728_v60 = vmul.f32 0.6931472, %v1005_v59 }
 0x358   :  { %v729_v61 = vsub.f32 %v721_v55, %v728_v60 }
 0x35a   :  { %730 = vst [vmem:[#allocation10] sm:$0x1] %v729_v61 }
 0x35b   :  { %1077 = shalt.err (!%p1074_p6)
}
 0x35c   :  { %740 = dma.vmem_to_hbm [thread:$0]  %s738_s16, 16, %s1303_s8, [#allocation7]  }
 0x35d   :  { %1090 = dma.done.wait [#allocation7], 16  }
 0x35e   :  { %1091 = vsyncadd [#allocation7], 4294967280 }
 0x35f   :  { %1092 = dma.done.wait [#allocation12], 16  }
 0x360   :  { %1093 = vsyncadd [#allocation12], 4294967280 }
 0x361   :  { %757 = vsyncpa [#allocation6], 1 }
 0x362   :  { %758 = vsyncpa [#allocation9], 1 }
 0x363   :  { %759 = vsyncpa [#allocation7], 1 }
 0x364   :  { %760 = vsyncpa [#allocation12], 1 }

</bundles_post_ra>
